<compile_context>
chip_gen: v6e
topology: v6e:2x2x1
jax: 0.10.0
libtpu: 0.0.40
codegen_flags: <defaults>
</compile_context>

<pallas_src>
import functools
import math

import jax
import jax.numpy as jnp
from jax.experimental import pallas as pl
from jax.experimental.pallas import tpu as pltpu


def make_pe_table(d_model: int, max_len: int) -> jnp.ndarray:
    """Replicates the buffer built in PositionalEncoding.__init__."""
    position = jnp.arange(max_len, dtype=jnp.float32)[:, None]            # (L, 1)
    div_term = jnp.exp(
        jnp.arange(0, d_model, 2, dtype=jnp.float32) * (-math.log(10000.0) / d_model)
    )                                                                     # (D/2,)
    pe = jnp.zeros((max_len, 1, d_model), dtype=jnp.float32)
    pe = pe.at[:, 0, 0::2].set(jnp.sin(position * div_term))
    pe = pe.at[:, 0, 1::2].set(jnp.cos(position * div_term))
    return pe


# ----------------------------- kernels ------------------------------------ #

def _pe_add_kernel(x_ref, pe_ref, o_ref):
    # x_ref: (B, TS, D), pe_ref: (TS, D) — broadcast add over the batch axis.
    o_ref[...] = (x_ref[...] + pe_ref[...]).astype(o_ref.dtype)


def _pe_add_dropout_kernel(x_ref, pe_ref, bits_ref, o_ref, *, thresh, scale):
    # Training-mode dropout: keep w.p. (1-p), scale kept values by 1/(1-p).
    # Integer threshold on raw uint32 bits; scale folded into the select.
    # TODO(synk): bit stream differs from torch's Bernoulli sampler (semantics
    # match: keep prob 1-p, scale 1/(1-p); the bits are not bit-identical).
    y = x_ref[...] + pe_ref[...]
    keep_scale = jnp.where(bits_ref[...] >= jnp.uint32(thresh),
                           jnp.float32(scale), jnp.float32(0.0))
    o_ref[...] = (y * keep_scale).astype(o_ref.dtype)


# ----------------------------- helpers ------------------------------------ #

def _choose_seq_tile(S, B, D, n_xlike, itemsize=4,
                     budget_bytes=24 * 1024 * 1024, max_ts=512):
    """Largest seq tile whose double-buffered footprint fits a VMEM budget.

    n_xlike = number of (B, TS, D)-shaped arrays in flight (x, out, [bits]).
    """
    row_bytes = (n_xlike * B * D + D) * itemsize     # all arrays, per seq row
    ts = budget_bytes // (2 * row_bytes)             # 2x for double buffering
    ts = int(max(8, min(ts, max_ts, S)))
    if ts < S:
        ts = max(8, (ts // 8) * 8)                   # keep (8, 128) tiling rule
    return ts


_COMPILER_PARAMS = pltpu.CompilerParams(dimension_semantics=("parallel",))


# ----------------------------- wrapper ------------------------------------ #

def positional_encoding_forward(x, pe_table, *, dropout_p=0.1,
                                training=False, rng_key=None):
    """Equivalent of PositionalEncoding.forward.

    x:        (seq_len, batch, d_model)
    pe_table: (max_len, 1, d_model)
    """
    S, B, D = x.shape
    pe2d = pe_table[:S, 0, :].astype(x.dtype)        # (S, D) dense slab
    xt = jnp.transpose(x, (1, 0, 2))                 # (B, S, D): dense sublanes

    use_dropout = training and dropout_p > 0.0
    if use_dropout and dropout_p >= 1.0:
        # PyTorch defines dropout(p=1) as all zeros in training mode.
        return jnp.zeros_like(x)

    if not use_dropout:
        ts = _choose_seq_tile(S, B, D, n_xlike=2)
        out_t = pl.pallas_call(
            _pe_add_kernel,
            out_shape=jax.ShapeDtypeStruct((B, S, D), x.dtype),
            grid_spec=pltpu.PrefetchScalarGridSpec(
                num_scalar_prefetch=0,
                grid=(pl.cdiv(S, ts),),
                in_specs=[
                    pl.BlockSpec((B, ts, D), lambda i: (0, i, 0)),
                    pl.BlockSpec((ts, D), lambda i: (i, 0)),
                ],
                out_specs=pl.BlockSpec((B, ts, D), lambda i: (0, i, 0)),
            ),
            compiler_params=_COMPILER_PARAMS,
        )(xt, pe2d)
        return jnp.transpose(out_t, (1, 0, 2))

    # Training path: stream uint32 random bits into the kernel.
    if rng_key is None:
        rng_key = jax.random.PRNGKey(0)
    bits = jax.random.bits(rng_key, (B, S, D), dtype=jnp.uint32)

    p = float(dropout_p)
    thresh = min(int(round(p * float(1 << 32))), (1 << 32) - 1)
    scale = 1.0 / (1.0 - p)
    kernel = functools.partial(_pe_add_dropout_kernel, thresh=thresh, scale=scale)

    ts = _choose_seq_tile(S, B, D, n_xlike=3)
    out_t = pl.pallas_call(
        kernel,
        out_shape=jax.ShapeDtypeStruct((B, S, D), x.dtype),
        grid_spec=pltpu.PrefetchScalarGridSpec(
            num_scalar_prefetch=0,
            grid=(pl.cdiv(S, ts),),
            in_specs=[
                pl.BlockSpec((B, ts, D), lambda i: (0, i, 0)),
                pl.BlockSpec((ts, D), lambda i: (i, 0)),
                pl.BlockSpec((B, ts, D), lambda i: (0, i, 0)),
            ],
            out_specs=pl.BlockSpec((B, ts, D), lambda i: (0, i, 0)),
        ),
        compiler_params=_COMPILER_PARAMS,
    )(xt, pe2d, bits)
    return jnp.transpose(out_t, (1, 0, 2))


# ------------------------------- main -------------------------------------- #

if __name__ == "__main__":
    seq_len, batch, d_model, max_len = 8, 2, 32, 64

    key = jax.random.PRNGKey(0)
    kx, kd = jax.random.split(key)
    x = jax.random.normal(kx, (seq_len, batch, d_model), dtype=jnp.float32)
    pe_table = make_pe_table(d_model, max_len)

    # Eval mode (dropout == identity): must match the reference exactly.
    out = positional_encoding_forward(x, pe_table, dropout_p=0.1, training=False)
    out = jax.block_until_ready(out)

    ref = x + pe_table[:seq_len]  # broadcast over batch
    assert out.shape == (seq_len, batch, d_model)
    assert jnp.allclose(out, ref, atol=1e-6, rtol=1e-6), "eval mismatch vs reference"

    # Training mode: in-kernel dropout (values are either 0 or (x+pe)/(1-p)).
    p = 0.1
    out_train = positional_encoding_forward(
        x, pe_table, dropout_p=p, training=True, rng_key=kd)
    out_train = jax.block_until_ready(out_train)
    assert out_train.shape == (seq_len, batch, d_model)
    scaled = ref * (1.0 / (1.0 - p))
    ok = jnp.isclose(out_train, 0.0, atol=1e-6) | jnp.isclose(
        out_train, scaled, atol=1e-5, rtol=1e-5)
    assert bool(ok.all()), "training output not in {0, (x+pe)/(1-p)}"

    print("KERNEL_OK")
</pallas_src>

<mosaic_0001>
module attributes {stable_mosaic.version = 11 : i64} {
  func.func @_pe_add_kernel(%arg0: i32, %arg1: memref<2x8x32xf32, #tpu.memory_space<vmem>>, %arg2: memref<8x32xf32, #tpu.memory_space<vmem>>, %arg3: memref<2x8x32xf32, #tpu.memory_space<vmem>>) attributes {dimension_semantics = [#tpu.dimension_semantics<parallel>], iteration_bounds = array<i64: 1>, scalar_prefetch = 0 : i64, scratch_operands = 0 : i64, tpu.core_type = #tpu.core_type<tc>, window_params = [{transform_indices = @transform_0, window_bounds = array<i64: 2, 8, 32>}, {transform_indices = @transform_1, window_bounds = array<i64: 8, 32>}, {transform_indices = @transform_2, window_bounds = array<i64: 2, 8, 32>}]} {
    %c0 = arith.constant 0 : index
    %c0_0 = arith.constant 0 : index
    %c0_1 = arith.constant 0 : index
    %0 = vector.load %arg1[%c0, %c0_0, %c0_1] : memref<2x8x32xf32, #tpu.memory_space<vmem>>, vector<2x8x32xf32>
    %c0_2 = arith.constant 0 : index
    %c0_3 = arith.constant 0 : index
    %1 = vector.load %arg2[%c0_2, %c0_3] : memref<8x32xf32, #tpu.memory_space<vmem>>, vector<8x32xf32>
    %2 = vector.shape_cast %1 : vector<8x32xf32> to vector<1x8x32xf32>
    %3 = vector.broadcast %2 : vector<1x8x32xf32> to vector<2x8x32xf32>
    %4 = arith.addf %0, %3 : vector<2x8x32xf32>
    %c0_4 = arith.constant 0 : index
    %c0_5 = arith.constant 0 : index
    %c0_6 = arith.constant 0 : index
    %5 = vector.load %arg3[%c0_4, %c0_5, %c0_6] : memref<2x8x32xf32, #tpu.memory_space<vmem>>, vector<2x8x32xf32>
    tpu.vector_store %arg3[%c0_4, %c0_5, %c0_6], %4 {strides = array<i32>} : memref<2x8x32xf32, #tpu.memory_space<vmem>>, vector<2x8x32xf32>,
    return
  }
  func.func @transform_0(%arg0: i32) -> (i32, i32, i32) {
    %c0_i32 = arith.constant 0 : i32
    %c0_i32_0 = arith.constant 0 : i32
    %c0_i32_1 = arith.constant 0 : i32
    return %c0_i32, %arg0, %c0_i32_0 : i32, i32, i32
  }
  func.func @transform_1(%arg0: i32) -> (i32, i32) {
    %c0_i32 = arith.constant 0 : i32
    %c0_i32_0 = arith.constant 0 : i32
    return %arg0, %c0_i32 : i32, i32
  }
  func.func @transform_2(%arg0: i32) -> (i32, i32, i32) {
    %c0_i32 = arith.constant 0 : i32
    %c0_i32_0 = arith.constant 0 : i32
    %c0_i32_1 = arith.constant 0 : i32
    return %c0_i32, %arg0, %c0_i32_0 : i32, i32, i32
  }
}

</mosaic_0001>

<bundles_post_ra>
// kernel: tpu_custom_call.1
= control target key start
LH: loop header
LB: loop body
LE: loop exit
PB: predicated region body
PF: predicated region fallthrough
CT: control target
= control target key end

     0   :  { %7 = vsyncpa [#allocation3], 0  ;;  %s170_s0 = inlined_call_operand.hbm [shape: f32[2,8,32], index: 0, kind: input, shape index: {}]   ;;  %s171_s1 = inlined_call_operand.hbm [shape: f32[8,32], index: 1, kind: input, shape index: {}]   ;;  %s172_s2 = inlined_call_operand.hbm [shape: f32[2,8,32], index: 2, kind: output, shape index: {}]  }
   0x1   :  { %8 = vsyncpa [#allocation6], 0 }
   0x2   :  { %9 = vsyncpa [#allocation4], 0  ;;  %s135_s9 = smov [#allocation2]  }
   0x3   :  { %s15_s10 = sshll.u32 %s135_s9, 4  ;;  %s16_s10 = int_to_ptr.vmem [resolvable:$true] %s15_s10 }
   0x4   :  { %s77_s11 = scalar_lea.vmem %s16_s10, 256  ;;  %p82_p1 = scmp.lt.s32.totalorder %s16_s10, %s16_s10 }
   0x5   :  { %p78_p0 = scmp.ne.s32.totalorder %s16_s10, %s77_s11  ;;  %p83_p2 = scmp.lt.s32.totalorder %s77_s11, %s77_s11 }
   0x7   :  { %p84_p3 = por %p83_p2, %p82_p1 }
   0x9   :  { %p85_p4 = pnand %p84_p3, %p78_p0 }
   0xb   :  { %88 = shalt.err (!%p85_p4)
}
   0xc   :  { %s136_s12 = smov 128   ;;  %s137_s13 = smov 8  }
   0xd   :  { %21 = dma.hbm_to_vmem [thread:$0]  %s170_s0, 256, %s16_s10, [#allocation3], %s136_s12, %s136_s12, %s137_s13  }
   0xe   :  { %s138_s16 = smov [#allocation5]  }
   0xf   :  { %s28_s17 = sshll.u32 %s138_s16, 4  ;;  %s29_s17 = int_to_ptr.vmem [resolvable:$true] %s28_s17 }
  0x10   :  { %s97_s18 = scalar_lea.vmem %s29_s17, 128  ;;  %p102_p6 = scmp.lt.s32.totalorder %s29_s17, %s29_s17 }
  0x11   :  { %p98_p5 = scmp.ne.s32.totalorder %s29_s17, %s97_s18  ;;  %p103_p7 = scmp.lt.s32.totalorder %s97_s18, %s97_s18 }
  0x13   :  { %p104_p8 = por %p103_p7, %p102_p6 }
  0x15   :  { %p105_p9 = pnand %p104_p8, %p98_p5 }
  0x17   :  { %108 = shalt.err (!%p105_p9)
}
  0x18   :  { %31 = dma.hbm_to_vmem [thread:$0]  %s171_s1, 128, %s29_s17, [#allocation6]  }
  0x19   :  { %129 = dma.done.wait [#allocation3], 256  }
  0x1a   :  { %130 = vsyncadd [#allocation3], 4294967040 }
  0x1b   :  { %131 = dma.done.wait [#allocation6], 128  }
  0x1c   :  { %132 = vsyncadd [#allocation6], 4294967168  ;;  %s139_s21 = smov [#allocation7]   ;;  %v38_v0 = vld [vmem:[#allocation2] sm:$0xff]  ;;  %v40_v1 = vld [vmem:[#allocation5] sm:$0xff]  ;;  %vm43_vm0 = vcmask 261120  }
  0x1d   :  { %s51_s0 = sshll.u32 %s139_s21, 4  ;;  %v39_v2 = vld [vmem:[#allocation2 + $0x8] sm:$0xff]  ;;  %v41_v3 = vadd.f32 %v40_v1, %v38_v0  ;;  %s52_s0 = int_to_ptr.vmem [resolvable:$true] %s51_s0 }
  0x1e   :  { %v42_v4 = vadd.f32 %v40_v1, %v39_v2  ;;  %s109_s22 = scalar_lea.vmem %s52_s0, 256  ;;  %p114_p11 = scmp.lt.s32.totalorder %s52_s0, %s52_s0 }
  0x1f   :  { %44 = vst.msk [vmem:[#allocation7] sm:$0xff] %vm43_vm0, %v41_v3  ;;  %p110_p10 = scmp.ne.s32.totalorder %s52_s0, %s109_s22  ;;  %p115_p12 = scmp.lt.s32.totalorder %s109_s22, %s109_s22 }
  0x20   :  { %45 = vst.msk [vmem:[#allocation7 + $0x8] sm:$0xff] %vm43_vm0, %v42_v4 }
  0x21   :  { %p116_p13 = por %p115_p12, %p114_p11 }
  0x23   :  { %p117_p0 = pnand %p116_p13, %p110_p10 }
  0x25   :  { %120 = shalt.err (!%p117_p0)
}
  0x26   :  { %57 = dma.vmem_to_hbm [thread:$0]  %s52_s0, 256, %s172_s2, [#allocation4], %s136_s12, %s136_s12, %s137_s13  }
  0x27   :  { %133 = dma.done.wait [#allocation4], 256  }
  0x28   :  { %134 = vsyncadd [#allocation4], 4294967040 }
  0x29   :  { %61 = vsyncpa [#allocation3], 1 }
  0x2a   :  { %62 = vsyncpa [#allocation6], 1 }
  0x2b   :  { %63 = vsyncpa [#allocation4], 1 }

</bundles_post_ra>
